<compile_context>
chip_gen: v7x
topology: tpu7x:2x2x1
jax: 0.10.0
libtpu: 0.0.40
codegen_flags: <defaults>
</compile_context>

<pallas_src>
import jax
import jax.numpy as jnp
from jax import lax
from jax.experimental import pallas as pl
from jax.experimental.pallas import tpu as pltpu


def _attention_head_kernel(xq_ref, xkv_ref, wq_ref, bq_ref, wkv_ref, bkv_ref,
                           o_ref, q_scr, m_scr, l_scr, acc_scr):
    """One (batch, q-tile, kv-tile) grid step of flash-style single-head attention.

    xq_ref  : (1, TQ, H) bf16   query rows of x
    xkv_ref : (1, TK, H) bf16   key/value rows of x
    wq_ref  : (H, H)     bf16   pre-transposed Wq with 1/scaling folded in
    bq_ref  : (1, H)     f32    bq with 1/scaling folded in
    wkv_ref : (H, 2H)    bf16   [Wk.T | Wv.T]
    bkv_ref : (1, 2H)    f32    [bk | bv]
    o_ref   : (1, TQ, H) f32
    scratch : q (TQ,H) f32, m/l (TQ,1) f32, acc (TQ,H) f32
    """
    H = o_ref.shape[-1]
    ki = pl.program_id(2)

    @pl.when(ki == 0)
    def _():
        # Project this query tile once per (batch, q-tile); scaling already folded.
        q = jnp.dot(xq_ref[0], wq_ref[...],
                    preferred_element_type=jnp.float32) + bq_ref[...]
        q_scr[...] = q
        m_scr[...] = jnp.full_like(m_scr, -jnp.inf)
        l_scr[...] = jnp.zeros_like(l_scr)
        acc_scr[...] = jnp.zeros_like(acc_scr)

    # Fused K/V projection for this kv tile: (TK, 2H), f32 accumulation.
    kv = jnp.dot(xkv_ref[0], wkv_ref[...],
                 preferred_element_type=jnp.float32) + bkv_ref[...]
    k = kv[:, :H].astype(jnp.bfloat16)        # (TK, H)
    v = kv[:, H:].astype(jnp.bfloat16)        # (TK, H)

    # scores = q @ k^T : contract the feature dim directly (no transpose materialized).
    s = lax.dot_general(q_scr[...].astype(jnp.bfloat16), k,
                        dimension_numbers=(((1,), (1,)), ((), ())),
                        preferred_element_type=jnp.float32)           # (TQ, TK)

    # Online softmax update.
    m_prev = m_scr[...]
    m_new = jnp.maximum(m_prev, jnp.max(s, axis=-1, keepdims=True))
    alpha = jnp.exp(m_prev - m_new)
    p = jnp.exp(s - m_new)
    l_scr[...] = alpha * l_scr[...] + jnp.sum(p, axis=-1, keepdims=True)
    acc_scr[...] = alpha * acc_scr[...] + jnp.dot(
        p.astype(jnp.bfloat16), v, preferred_element_type=jnp.float32)
    m_scr[...] = m_new

    @pl.when(ki == pl.num_programs(2) - 1)
    def _():
        out = acc_scr[...] * pl.reciprocal(l_scr[...], approx=True)
        o_ref[0] = out.astype(o_ref.dtype)


def _pick_tile(dim, target):
    """Largest divisor of `dim` that is <= target and a multiple of 16, else dim."""
    if dim <= target:
        return dim
    for t in range(min(target, dim), 15, -1):
        if dim % t == 0 and t % 16 == 0:
            return t
    return dim


def attention_head_forward(x, wq, bq, wk, bk, wv, bv, scaling,
                           *, q_block=256, kv_block=512):
    """x: (B, S, H) f32. w*: (H, H) torch-layout (out, in). b*: (H,). Returns (B, S, H)."""
    B, S, H = x.shape
    inv_scale = jnp.float32(1.0) / jnp.float32(scaling)

    # Fold "/ scaling" into the query projection; pre-transpose to (in, out) layout;
    # cast MXU operands to bf16 once here (not per grid step).
    wq_t = (wq.T.astype(jnp.float32) * inv_scale).astype(jnp.bfloat16)        # (H, H)
    bq_f = (bq.astype(jnp.float32) * inv_scale).reshape(1, H)                 # (1, H)
    # Fuse K and V projections into a single (H, 2H) matmul per kv tile.
    wkv_t = jnp.concatenate([wk.T, wv.T], axis=1).astype(jnp.bfloat16)        # (H, 2H)
    bkv_f = jnp.concatenate([bk, bv]).astype(jnp.float32).reshape(1, 2 * H)   # (1, 2H)
    x_bf = x.astype(jnp.bfloat16)

    tq = _pick_tile(S, q_block)
    tk = _pick_tile(S, kv_block)
    grid = (B, S // tq, S // tk)

    full_hh = pl.BlockSpec((H, H), lambda b, qi, ki: (0, 0))
    full_1h = pl.BlockSpec((1, H), lambda b, qi, ki: (0, 0))
    full_h2h = pl.BlockSpec((H, 2 * H), lambda b, qi, ki: (0, 0))
    full_12h = pl.BlockSpec((1, 2 * H), lambda b, qi, ki: (0, 0))

    return pl.pallas_call(
        _attention_head_kernel,
        out_shape=jax.ShapeDtypeStruct((B, S, H), x.dtype),
        grid_spec=pltpu.PrefetchScalarGridSpec(
            num_scalar_prefetch=0,
            grid=grid,
            in_specs=[
                pl.BlockSpec((1, tq, H), lambda b, qi, ki: (b, qi, 0)),   # x (query rows)
                pl.BlockSpec((1, tk, H), lambda b, qi, ki: (b, ki, 0)),   # x (kv rows)
                full_hh, full_1h,                                         # Wq (scaled), bq (scaled)
                full_h2h, full_12h,                                       # [Wk|Wv], [bk|bv]
            ],
            out_specs=pl.BlockSpec((1, tq, H), lambda b, qi, ki: (b, qi, 0)),
            scratch_shapes=[
                pltpu.VMEM((tq, H), jnp.float32),     # cached q tile
                pltpu.VMEM((tq, 1), jnp.float32),     # running max m
                pltpu.VMEM((tq, 1), jnp.float32),     # running denom l
                pltpu.VMEM((tq, H), jnp.float32),     # output accumulator
            ],
        ),
        compiler_params=pltpu.CompilerParams(
            # batch / q-tile axes are independent (megacore-shardable); the kv axis
            # carries the online-softmax state and must stay sequential.
            dimension_semantics=("parallel", "parallel", "arbitrary"),
            # NOTE: for large S/H, raise vmem_limit_bytes here and re-derive tile
            # sizes per generation (v7x: 64 MiB physical VMEM; v5e: 4x128^2 MXU).
        ),
    )(x_bf, x_bf, wq_t, bq_f, wkv_t, bkv_f)


if __name__ == "__main__":
    # Small, deterministic example consistent with the module.
    B, S, H = 2, 8, 32
    num_heads = 4
    dropout = 0.1  # identity in inference mode
    scaling = (H // num_heads) ** (-0.5)

    key = jax.random.PRNGKey(0)
    kx, k1, k2, k3, k4, k5, k6 = jax.random.split(key, 7)

    x = jax.random.normal(kx, (B, S, H), dtype=jnp.float32)
    # nn.Linear(hidden_dim, hidden_dim): weight (H, H), bias (H,)
    wq = jax.random.normal(k1, (H, H), dtype=jnp.float32) * 0.1
    bq = jax.random.normal(k2, (H,), dtype=jnp.float32) * 0.1
    wk = jax.random.normal(k3, (H, H), dtype=jnp.float32) * 0.1
    bk = jax.random.normal(k4, (H,), dtype=jnp.float32) * 0.1
    wv = jax.random.normal(k5, (H, H), dtype=jnp.float32) * 0.1
    bv = jax.random.normal(k6, (H,), dtype=jnp.float32) * 0.1

    out = attention_head_forward(x, wq, bq, wk, bk, wv, bv, scaling)
    out = jax.block_until_ready(out)

    # Pure-JAX f32 reference (same math as the torch forward, eval mode).
    q = x @ wq.T + bq
    k_ = x @ wk.T + bk
    v = x @ wv.T + bv
    scores = jnp.einsum("bqh,bkh->bqk", q, k_) / scaling
    probs = jax.nn.softmax(scores, axis=-1)
    ref = jnp.einsum("bqk,bkh->bqh", probs, v)

    # bf16 MXU operands (f32 accumulation) -> relaxed tolerance vs the f32 reference.
    max_diff = float(jnp.max(jnp.abs(out - ref)))
    assert jnp.allclose(out, ref, atol=5e-2, rtol=5e-2), (
        f"mismatch vs reference: max abs diff = {max_diff}")

    print("KERNEL_OK")
</pallas_src>

<mosaic_0001>
module attributes {stable_mosaic.version = 11 : i64} {
  func.func @_attention_head_kernel(%arg0: i32, %arg1: i32, %arg2: i32, %arg3: memref<1x8x32xbf16, #tpu.memory_space<vmem>>, %arg4: memref<1x8x32xbf16, #tpu.memory_space<vmem>>, %arg5: memref<32x32xbf16, #tpu.memory_space<vmem>>, %arg6: memref<1x32xf32, #tpu.memory_space<vmem>>, %arg7: memref<32x64xbf16, #tpu.memory_space<vmem>>, %arg8: memref<1x64xf32, #tpu.memory_space<vmem>>, %arg9: memref<1x8x32xf32, #tpu.memory_space<vmem>>, %arg10: memref<8x32xf32, #tpu.memory_space<vmem>>, %arg11: memref<8x1xf32, #tpu.memory_space<vmem>>, %arg12: memref<8x1xf32, #tpu.memory_space<vmem>>, %arg13: memref<8x32xf32, #tpu.memory_space<vmem>>) attributes {dimension_semantics = [#tpu.dimension_semantics<parallel>, #tpu.dimension_semantics<parallel>, #tpu.dimension_semantics<arbitrary>], iteration_bounds = array<i64: 2, 1, 1>, scalar_prefetch = 0 : i64, scratch_operands = 4 : i64, tpu.core_type = #tpu.core_type<tc>, window_params = [{transform_indices = @transform_0, window_bounds = array<i64: 1, 8, 32>}, {transform_indices = @transform_1, window_bounds = array<i64: 1, 8, 32>}, {pipeline_mode = #tpu.pipeline_mode<synchronous>, transform_indices = @transform_2, window_bounds = array<i64: 32, 32>}, {pipeline_mode = #tpu.pipeline_mode<synchronous>, transform_indices = @transform_3, window_bounds = array<i64: 1, 32>}, {pipeline_mode = #tpu.pipeline_mode<synchronous>, transform_indices = @transform_4, window_bounds = array<i64: 32, 64>}, {pipeline_mode = #tpu.pipeline_mode<synchronous>, transform_indices = @transform_5, window_bounds = array<i64: 1, 64>}, {transform_indices = @transform_6, window_bounds = array<i64: 1, 8, 32>}]} {
    %c0_i32 = arith.constant 0 : i32
    %0 = arith.cmpi eq, %arg2, %c0_i32 : i32
    %1 = arith.extui %0 : i1 to i32
    %c0_i32_0 = arith.constant 0 : i32
    %2 = arith.cmpi ne, %1, %c0_i32_0 : i32
    scf.if %2 {
      %c0_27 = arith.constant 0 : index
      %c0_28 = arith.constant 0 : index
      %c0_29 = arith.constant 0 : index
      %43 = vector.load %arg3[%c0_27, %c0_28, %c0_29] : memref<1x8x32xbf16, #tpu.memory_space<vmem>>, vector<1x8x32xbf16>
      %44 = vector.shape_cast %43 : vector<1x8x32xbf16> to vector<8x32xbf16>
      %c0_30 = arith.constant 0 : index
      %c0_31 = arith.constant 0 : index
      %45 = vector.load %arg5[%c0_30, %c0_31] : memref<32x32xbf16, #tpu.memory_space<vmem>>, vector<32x32xbf16>
      %cst_32 = arith.constant dense<0.000000e+00> : vector<8x32xf32>
      %46 = tpu.matmul %44, %45, %cst_32 {dimension_numbers = #tpu.dot_dimension_numbers<[1], [0], [0], [1], [0, 0, 1, 1], [], []>} : vector<8x32xbf16>, vector<32x32xbf16>, vector<8x32xf32> -> vector<8x32xf32>
      %c0_33 = arith.constant 0 : index
      %c0_34 = arith.constant 0 : index
      %47 = vector.load %arg6[%c0_33, %c0_34] : memref<1x32xf32, #tpu.memory_space<vmem>>, vector<1x32xf32>
      %48 = vector.broadcast %47 : vector<1x32xf32> to vector<8x32xf32>
      %49 = arith.addf %46, %48 : vector<8x32xf32>
      %c0_35 = arith.constant 0 : index
      %c0_36 = arith.constant 0 : index
      %50 = vector.load %arg10[%c0_35, %c0_36] : memref<8x32xf32, #tpu.memory_space<vmem>>, vector<8x32xf32>
      tpu.vector_store %arg10[%c0_35, %c0_36], %49 {strides = array<i32>} : memref<8x32xf32, #tpu.memory_space<vmem>>, vector<8x32xf32>,
      %cst_37 = arith.constant 0xFF800000 : f32
      %51 = vector.broadcast %cst_37 : f32 to vector<8x1xf32>
      %c0_38 = arith.constant 0 : index
      %c0_39 = arith.constant 0 : index
      %52 = vector.load %arg11[%c0_38, %c0_39] : memref<8x1xf32, #tpu.memory_space<vmem>>, vector<8x1xf32>
      tpu.vector_store %arg11[%c0_38, %c0_39], %51 {strides = array<i32>} : memref<8x1xf32, #tpu.memory_space<vmem>>, vector<8x1xf32>,
      %cst_40 = arith.constant 0.000000e+00 : f32
      %53 = vector.broadcast %cst_40 : f32 to vector<8x1xf32>
      %c0_41 = arith.constant 0 : index
      %c0_42 = arith.constant 0 : index
      %54 = vector.load %arg12[%c0_41, %c0_42] : memref<8x1xf32, #tpu.memory_space<vmem>>, vector<8x1xf32>
      tpu.vector_store %arg12[%c0_41, %c0_42], %53 {strides = array<i32>} : memref<8x1xf32, #tpu.memory_space<vmem>>, vector<8x1xf32>,
      %cst_43 = arith.constant 0.000000e+00 : f32
      %55 = vector.broadcast %cst_43 : f32 to vector<8x32xf32>
      %c0_44 = arith.constant 0 : index
      %c0_45 = arith.constant 0 : index
      %56 = vector.load %arg13[%c0_44, %c0_45] : memref<8x32xf32, #tpu.memory_space<vmem>>, vector<8x32xf32>
      tpu.vector_store %arg13[%c0_44, %c0_45], %55 {strides = array<i32>} : memref<8x32xf32, #tpu.memory_space<vmem>>, vector<8x32xf32>,
    } else {
    }
    %c0 = arith.constant 0 : index
    %c0_1 = arith.constant 0 : index
    %c0_2 = arith.constant 0 : index
    %3 = vector.load %arg4[%c0, %c0_1, %c0_2] : memref<1x8x32xbf16, #tpu.memory_space<vmem>>, vector<1x8x32xbf16>
    %4 = vector.shape_cast %3 : vector<1x8x32xbf16> to vector<8x32xbf16>
    %c0_3 = arith.constant 0 : index
    %c0_4 = arith.constant 0 : index
    %5 = vector.load %arg7[%c0_3, %c0_4] : memref<32x64xbf16, #tpu.memory_space<vmem>>, vector<32x64xbf16>
    %cst = arith.constant dense<0.000000e+00> : vector<8x64xf32>
    %6 = tpu.matmul %4, %5, %cst {dimension_numbers = #tpu.dot_dimension_numbers<[1], [0], [0], [1], [0, 0, 1, 1], [], []>} : vector<8x32xbf16>, vector<32x64xbf16>, vector<8x64xf32> -> vector<8x64xf32>
    %c0_5 = arith.constant 0 : index
    %c0_6 = arith.constant 0 : index
    %7 = vector.load %arg8[%c0_5, %c0_6] : memref<1x64xf32, #tpu.memory_space<vmem>>, vector<1x64xf32>
    %8 = vector.broadcast %7 : vector<1x64xf32> to vector<8x64xf32>
    %9 = arith.addf %6, %8 : vector<8x64xf32>
    %10 = vector.extract_strided_slice %9 {offsets = [0, 0], sizes = [8, 32], strides = [1, 1]} : vector<8x64xf32> to vector<8x32xf32>
    %11 = arith.truncf %10 : vector<8x32xf32> to vector<8x32xbf16>
    %12 = vector.extract_strided_slice %9 {offsets = [0, 32], sizes = [8, 32], strides = [1, 1]} : vector<8x64xf32> to vector<8x32xf32>
    %13 = arith.truncf %12 : vector<8x32xf32> to vector<8x32xbf16>
    %c0_7 = arith.constant 0 : index
    %c0_8 = arith.constant 0 : index
    %14 = vector.load %arg10[%c0_7, %c0_8] : memref<8x32xf32, #tpu.memory_space<vmem>>, vector<8x32xf32>
    %15 = arith.truncf %14 : vector<8x32xf32> to vector<8x32xbf16>
    %cst_9 = arith.constant dense<0.000000e+00> : vector<8x8xf32>
    %16 = tpu.matmul %15, %11, %cst_9 {dimension_numbers = #tpu.dot_dimension_numbers<[1], [1], [0], [0], [0, 0, 1, 0], [], []>} : vector<8x32xbf16>, vector<8x32xbf16>, vector<8x8xf32> -> vector<8x8xf32>
    %c0_10 = arith.constant 0 : index
    %c0_11 = arith.constant 0 : index
    %17 = vector.load %arg11[%c0_10, %c0_11] : memref<8x1xf32, #tpu.memory_space<vmem>>, vector<8x1xf32>
    %cst_12 = arith.constant dense<0xFF800000> : vector<8xf32>
    %18 = vector.multi_reduction <maximumf>, %16, %cst_12 [1] : vector<8x8xf32> to vector<8xf32>
    %19 = vector.shape_cast %18 : vector<8xf32> to vector<8x1xf32>
    %20 = arith.maximumf %17, %19 : vector<8x1xf32>
    %21 = arith.subf %17, %20 : vector<8x1xf32>
    %22 = math.exp %21 : vector<8x1xf32>
    %23 = vector.broadcast %20 : vector<8x1xf32> to vector<8x8xf32>
    %24 = arith.subf %16, %23 : vector<8x8xf32>
    %25 = math.exp %24 : vector<8x8xf32>
    %c0_13 = arith.constant 0 : index
    %c0_14 = arith.constant 0 : index
    %26 = vector.load %arg12[%c0_13, %c0_14] : memref<8x1xf32, #tpu.memory_space<vmem>>, vector<8x1xf32>
    %27 = arith.mulf %22, %26 : vector<8x1xf32>
    %cst_15 = arith.constant dense<0.000000e+00> : vector<8xf32>
    %28 = vector.multi_reduction <add>, %25, %cst_15 [1] : vector<8x8xf32> to vector<8xf32>
    %29 = vector.shape_cast %28 : vector<8xf32> to vector<8x1xf32>
    %30 = arith.addf %27, %29 : vector<8x1xf32>
    %c0_16 = arith.constant 0 : index
    %c0_17 = arith.constant 0 : index
    %31 = vector.load %arg12[%c0_16, %c0_17] : memref<8x1xf32, #tpu.memory_space<vmem>>, vector<8x1xf32>
    tpu.vector_store %arg12[%c0_16, %c0_17], %30 {strides = array<i32>} : memref<8x1xf32, #tpu.memory_space<vmem>>, vector<8x1xf32>,
    %c0_18 = arith.constant 0 : index
    %c0_19 = arith.constant 0 : index
    %32 = vector.load %arg13[%c0_18, %c0_19] : memref<8x32xf32, #tpu.memory_space<vmem>>, vector<8x32xf32>
    %33 = vector.broadcast %22 : vector<8x1xf32> to vector<8x32xf32>
    %34 = arith.mulf %33, %32 : vector<8x32xf32>
    %35 = arith.truncf %25 : vector<8x8xf32> to vector<8x8xbf16>
    %cst_20 = arith.constant dense<0.000000e+00> : vector<8x32xf32>
    %36 = tpu.matmul %35, %13, %cst_20 {dimension_numbers = #tpu.dot_dimension_numbers<[1], [0], [0], [1], [0, 0, 1, 1], [], []>} : vector<8x8xbf16>, vector<8x32xbf16>, vector<8x32xf32> -> vector<8x32xf32>
    %37 = arith.addf %34, %36 : vector<8x32xf32>
    %c0_21 = arith.constant 0 : index
    %c0_22 = arith.constant 0 : index
    %38 = vector.load %arg13[%c0_21, %c0_22] : memref<8x32xf32, #tpu.memory_space<vmem>>, vector<8x32xf32>
    tpu.vector_store %arg13[%c0_21, %c0_22], %37 {strides = array<i32>} : memref<8x32xf32, #tpu.memory_space<vmem>>, vector<8x32xf32>,
    %c0_23 = arith.constant 0 : index
    %c0_24 = arith.constant 0 : index
    %39 = vector.load %arg11[%c0_23, %c0_24] : memref<8x1xf32, #tpu.memory_space<vmem>>, vector<8x1xf32>
    tpu.vector_store %arg11[%c0_23, %c0_24], %20 {strides = array<i32>} : memref<8x1xf32, #tpu.memory_space<vmem>>, vector<8x1xf32>,
    %c0_i32_25 = arith.constant 0 : i32
    %40 = arith.cmpi eq, %arg2, %c0_i32_25 : i32
    %41 = arith.extui %40 : i1 to i32
    %c0_i32_26 = arith.constant 0 : i32
    %42 = arith.cmpi ne, %41, %c0_i32_26 : i32
    scf.if %42 {
      %c0_27 = arith.constant 0 : index
      %c0_28 = arith.constant 0 : index
      %43 = vector.load %arg13[%c0_27, %c0_28] : memref<8x32xf32, #tpu.memory_space<vmem>>, vector<8x32xf32>
      %c0_29 = arith.constant 0 : index
      %c0_30 = arith.constant 0 : index
      %44 = vector.load %arg12[%c0_29, %c0_30] : memref<8x1xf32, #tpu.memory_space<vmem>>, vector<8x1xf32>
      %45 = tpu.reciprocal %44 {approx = true} : vector<8x1xf32> -> vector<8x1xf32>
      %46 = vector.broadcast %45 : vector<8x1xf32> to vector<8x32xf32>
      %47 = arith.mulf %43, %46 : vector<8x32xf32>
      %c0_31 = arith.constant 0 : index
      %c0_32 = arith.constant 0 : index
      %c0_33 = arith.constant 0 : index
      %48 = vector.load %arg9[%c0_31, %c0_32, %c0_33] : memref<1x8x32xf32, #tpu.memory_space<vmem>>, vector<1x8x32xf32>
      %49 = vector.shape_cast %48 : vector<1x8x32xf32> to vector<8x32xf32>
      %50 = vector.shape_cast %47 : vector<8x32xf32> to vector<1x8x32xf32>
      tpu.vector_store %arg9[%c0_31, %c0_32, %c0_33], %50 {strides = array<i32>} : memref<1x8x32xf32, #tpu.memory_space<vmem>>, vector<1x8x32xf32>,
    } else {
    }
    return
  }
  func.func @transform_0(%arg0: i32, %arg1: i32, %arg2: i32) -> (i32, i32, i32) {
    %c0_i32 = arith.constant 0 : i32
    %c0_i32_0 = arith.constant 0 : i32
    return %arg0, %arg1, %c0_i32 : i32, i32, i32
  }
  func.func @transform_1(%arg0: i32, %arg1: i32, %arg2: i32) -> (i32, i32, i32) {
    %c0_i32 = arith.constant 0 : i32
    %c0_i32_0 = arith.constant 0 : i32
    return %arg0, %arg2, %c0_i32 : i32, i32, i32
  }
  func.func @transform_2(%arg0: i32, %arg1: i32, %arg2: i32) -> (i32, i32) {
    %c0_i32 = arith.constant 0 : i32
    %c0_i32_0 = arith.constant 0 : i32
    %c0_i32_1 = arith.constant 0 : i32
    return %c0_i32, %c0_i32_0 : i32, i32
  }
  func.func @transform_3(%arg0: i32, %arg1: i32, %arg2: i32) -> (i32, i32) {
    %c0_i32 = arith.constant 0 : i32
    %c0_i32_0 = arith.constant 0 : i32
    %c0_i32_1 = arith.constant 0 : i32
    return %c0_i32, %c0_i32_0 : i32, i32
  }
  func.func @transform_4(%arg0: i32, %arg1: i32, %arg2: i32) -> (i32, i32) {
    %c0_i32 = arith.constant 0 : i32
    %c0_i32_0 = arith.constant 0 : i32
    %c0_i32_1 = arith.constant 0 : i32
    return %c0_i32, %c0_i32_0 : i32, i32
  }
  func.func @transform_5(%arg0: i32, %arg1: i32, %arg2: i32) -> (i32, i32) {
    %c0_i32 = arith.constant 0 : i32
    %c0_i32_0 = arith.constant 0 : i32
    %c0_i32_1 = arith.constant 0 : i32
    return %c0_i32, %c0_i32_0 : i32, i32
  }
  func.func @transform_6(%arg0: i32, %arg1: i32, %arg2: i32) -> (i32, i32, i32) {
    %c0_i32 = arith.constant 0 : i32
    %c0_i32_0 = arith.constant 0 : i32
    return %arg0, %arg1, %c0_i32 : i32, i32, i32
  }
}

</mosaic_0001>

<bundles_post_ra>
// kernel: tpu_custom_call.1
= control target key start
LH: loop header
LB: loop body
LE: loop exit
PB: predicated region body
PF: predicated region fallthrough
CT: control target
= control target key end

     0   :  { %s1539_s0 = inlined_call_operand.hbm [shape: bf16[2,8,32], index: 0, kind: input, shape index: {}]   ;;  %s1540_s1 = inlined_call_operand.hbm [shape: bf16[2,8,32], index: 1, kind: input, shape index: {}]   ;;  %s1541_s2 = inlined_call_operand.hbm [shape: bf16[32,32], index: 2, kind: input, shape index: {}]   ;;  %s1542_s3 = inlined_call_operand.vmem [shape: f32[1,32], index: 3, kind: input, shape index: {}]   ;;  %s1543_s4 = inlined_call_operand.hbm [shape: bf16[32,64], index: 4, kind: input, shape index: {}]   ;;  %s1544_s5 = inlined_call_operand.vmem [shape: f32[1,64], index: 5, kind: input, shape index: {}]   ;;  %s1545_s6 = inlined_call_operand.hbm [shape: f32[2,8,32], index: 6, kind: output, shape index: {}]  }
   0x1   :  { %1552 = sst [smem:[#allocation23_spill]] %s1541_s2 }
   0x2   :  { %1553 = sst [smem:[#allocation24_spill]] %s1543_s4 }
   0x3   :  { %11 = vsyncpa [#allocation7], 0 }
   0x4   :  { %13 = vsyncpa [#allocation7 + $0x1], 0 }
   0x5   :  { %14 = vsyncpa [#allocation10], 0 }
   0x6   :  { %16 = vsyncpa [#allocation10 + $0x1], 0 }
   0x7   :  { %17 = vsyncpa [#allocation13], 0 }
   0x8   :  { %18 = vsyncpa [#allocation8], 0 }
   0x9   :  { %20 = vsyncpa [#allocation8 + $0x1], 0  ;;  %s1229_s21 = smov 0   ;;  %s1231_s22 = smov 0  }
   0xa   :  { %s1233_s23 = smov 0   ;;  %s1235_s24 = smov 0  }
   0xb   :  { %s1237_s25 = smov 0   ;;  %s1239_s26 = smov 0  }
   0xc LB: > { %1554 = sst [smem:[#allocation20_spill]] %s1176_s25  ;;  %s1260_s27 = sadd.s32 4294967295, %s1180_s26   ;;  %s1180_s26 = sphi %s1239_s26, %s26_s26   ;;  %s1176_s25 = sphi %s1237_s25, %s1577_s25   ;;  %s1172_s24 = sphi %s1235_s24, %s1576_s24   ;;  %s1168_s23 = sphi %s1233_s23, %s1580_s23   ;;  %s1164_s22 = sphi %s1231_s22, %s1579_s22   ;;  %s1160_s21 = sphi %s1229_s21, %s1578_s21  }
   0xd   : > { %s796_s28 = sadd.s32 4294967294, %s1180_s26   ;;  %p67_p0 = scmp.ne.s32.totalorder %s1164_s22, %s1160_s21 }
   0xe   : > { %p1546_p1 = scmp.eq.s32.totalorder %s1260_s27, 0  ;;  %p211_p3 = scmp.eq.s32.totalorder %s796_s28, 1 }
   0xf   : > { %p797_p5 = scmp.ge.s32.totalorder %s1180_s26, 1  ;;  %p218_p7 = scmp.lt.s32.totalorder %s1180_s26, 3 }
  0x10   : > { %p1269_p4 = por %p1546_p1, %p67_p0  ;;  %p1274_p6 = por %p211_p3, %p67_p0 }
  0x11   : > { %p1279_p8 = pnand %p797_p5, %p218_p7  ;;  %s1182_s8 = smov [#allocation11]  }
  0x12   : > { %s1555_s29 = scalar_select %p1269_p4, 1, 0 }
  0x13   : > { %s1556_s30 = scalar_select %p1274_p6, 1, 0 }
  0x14   : > { %s1557_s7 = scalar_select %p1279_p8, 1, 0 }
  0x15   : > { %s230_s9 = sshll.u32 %s1182_s8, 4  ;;  %p877_p9 = pneg %p1279_p8  ;;  %s1283_s9 = int_to_ptr.vmem [resolvable:$true] %s230_s9 }
  0x16   : > { %s1183_s11 = smov [#allocation12]   ;;  %s1559_s2 = sld [smem:[#allocation23_spill]] }
  0x17   : > { %p1290_p11 = pnand %p877_p9, %p1546_p1  ;;  %s246_s12 = sshll.u32 %s1183_s11, 4  ;;  %s1294_s12 = int_to_ptr.vmem [resolvable:$true] %s246_s12 }
  0x19   : > { %p972_p13 = pneg %p1290_p11 }
  0x1c   : > { %s970_s15 = scalar_lea.hbm %s1559_s2, 256 }
  0x1d   : > { %p971_p12 = scmp.ne.s32.totalorder %s1559_s2, %s970_s15  ;;  %p977_p5 = scmp.lt.u32.totalorder %s970_s15, %s1559_s2 }
  0x1f   : > { %p973_p0 = pnand %p972_p13, %p971_p12 }
  0x21   : > { %p974_p3 = pneg %p973_p0 }
  0x23   : > { %p979_p7 = pnand %p977_p5, %p974_p3 }
  0x25   : > { %982 = shalt.err (!%p979_p7)
}
  0x26   : > { %s983_s20 = scalar_lea.vmem %s1283_s9, 256  ;;  %p991_p2 = scmp.lt.s32.totalorder %s1283_s9, %s1283_s9 }
  0x27   : > { %p984_p9 = scmp.ne.s32.totalorder %s1283_s9, %s983_s20  ;;  %p992_p12 = scmp.lt.s32.totalorder %s983_s20, %s983_s20 }
  0x29   : > { %p986_p10 = pnand %p984_p9, %p972_p13  ;;  %p993_p0 = por %p992_p12, %p991_p2 }
  0x2b   : > { %p987_p1 = pneg %p986_p10 }
  0x2d   : > { %p994_p6 = pnand %p993_p0, %p987_p1 }
  0x2f   : > { %997 = shalt.err (!%p994_p6)
}
  0x30   : > { %s1184_s28 = smov 64   ;;  %s1185_s8 = smov 4  }
  0x31   : > { %880 = dma.hbm_to_vmem [thread:$0]  (!%p1290_p11), %s1559_s2, 256, %s1283_s9, [#allocation10], %s1184_s28, %s1184_s28, %s1185_s8  }
  0x32   : > { %s1560_s4 = sld [smem:[#allocation24_spill]] }
  0x38   : > { %s998_s16 = scalar_lea.hbm %s1560_s4, 256 }
  0x39   : > { %p999_p2 = scmp.ne.s32.totalorder %s1560_s4, %s998_s16  ;;  %p1005_p10 = scmp.lt.u32.totalorder %s998_s16, %s1560_s4 }
  0x3b   : > { %p1001_p1 = pnand %p999_p2, %p972_p13 }
  0x3d   : > { %p1002_p6 = pneg %p1001_p1 }
  0x3f   : > { %p1007_p3 = pnand %p1005_p10, %p1002_p6 }
  0x41   : > { %1010 = shalt.err (!%p1007_p3)
}
  0x42   : > { %s1011_s9 = scalar_lea.vmem %s1294_s12, 256  ;;  %p1019_p12 = scmp.lt.s32.totalorder %s1294_s12, %s1294_s12 }
  0x43   : > { %p1012_p5 = scmp.ne.s32.totalorder %s1294_s12, %s1011_s9  ;;  %p1020_p0 = scmp.lt.s32.totalorder %s1011_s9, %s1011_s9 }
  0x45   : > { %p1014_p7 = pnand %p1012_p5, %p972_p13  ;;  %p1021_p2 = por %p1020_p0, %p1019_p12 }
  0x47   : > { %p1015_p9 = pneg %p1014_p7 }
  0x49   : > { %p1022_p1 = pnand %p1021_p2, %p1015_p9 }
  0x4b   : > { %1025 = shalt.err (!%p1022_p1)
}
  0x4c   : > { %883 = dma.hbm_to_vmem [thread:$0]  (!%p1290_p11), %s1560_s4, 256, %s1294_s12, [#allocation13], %s1184_s28, %s1184_s28, %s1185_s8  }
  0x4d   : > { %s45_s14 = sadd.s32 1, %s1176_s25  ;;  %s54_s15 = sadd.s32 1, %s1168_s23 }
  0x4e   : > { %p47_p13 = scmp.ge.s32.totalorder %s45_s14, 2  ;;  %p61_p6 = scmp.ne.s32.totalorder %s1168_s23, %s1164_s22 }
  0x4f   : > { %p62_p10 = scmp.eq.s32.totalorder %s1180_s26, 0  ;;  %p897_p3 = scmp.lt.s32.totalorder %s1180_s26, 2 }
  0x50   : > { %s1582_s14 = smov (%p47_p13, %s45_s14), 0  ;;  %p1562_p7 = scmp.eq.s32.totalorder %s1260_s27, 1 }
  0x51   : > { %1561 = sst [smem:[#allocation21_spill]] %s1582_s14  ;;  %p63_p5 = por %p62_p10, %p61_p6 }
  0x52   : > { %p1358_p9 = por %p1562_p7, %p61_p6  ;;  %s49_s16 = ssub.s32 %s1176_s25, %s1582_s14 }
  0x53   : > { %s263_s17 = sand.u32 1, %s1168_s23   ;;  %p52_p12 = scmp.eq.s32.totalorder %s49_s16, 0 }
  0x54   : > { %s1563_s10 = scalar_select %p1358_p9, 1, 0 }
  0x55   : > { %s1365_s12 = sshll.u32 %s263_s17, 2  ;;  %s802_s28 = sshll.u32 %s1176_s25, 6 }
  0x56   : > { %s1369_s8 = scalar_select %p52_p12, %s1168_s23, %s54_s15  }
  0x57   : > { %s1374_s20 = scalar_lea.hbm %s1539_s0, %s802_s28  ;;  %s267_s9 = scalar_lea.vmem [#allocation6], %s1365_s12 }
  0x58   : > { %1564 = sst [smem:[#allocation22_spill]] %s1369_s8  ;;  %s275_s11 = sshll.u32 %s267_s9, 4  ;;  %s1383_s11 = int_to_ptr.vmem [resolvable:$true] %s275_s11 }
  0x59   : > { %p1379_p11 = pnand %p897_p3, %p63_p5  ;;  %s1388_s18 = scalar_lea.hbm %s1540_s1, %s802_s28 }
  0x5a   : > { %s264_s19 = scalar_lea.sflag [#allocation7], %s263_s17  ;;  %s1026_s2 = scalar_lea.hbm %s1374_s20, 64 }
  0x5b   : > { %p1027_p0 = scmp.ne.s32.totalorder %s1374_s20, %s1026_s2  ;;  %p1028_p2 = pneg %p1379_p11 }
  0x5c   : > { %s1031_s14 = scalar_lea.hbm %s1539_s0, 128  ;;  %p1032_p6 = scmp.lt.u32.totalorder %s1374_s20, %s1539_s0 }
  0x5d   : > { %p1029_p1 = pnand %p1028_p2, %p1027_p0  ;;  %p1033_p10 = scmp.lt.u32.totalorder %s1031_s14, %s1026_s2 }
  0x5e   : > { %p1035_p5 = scmp.lt.u32.totalorder %s1026_s2, %s1374_s20 }
  0x5f   : > { %p1030_p13 = pneg %p1029_p1  ;;  %p1034_p3 = por %p1033_p10, %p1032_p6 }
  0x61   : > { %p1036_p7 = por %p1035_p5, %p1034_p3 }
  0x63   : > { %p1037_p12 = pnand %p1036_p7, %p1030_p13 }
  0x65   : > { %1040 = shalt.err (!%p1037_p12)
}
  0x66   : > { %s1041_s17 = scalar_lea.vmem %s1383_s11, 64  ;;  %s1186_s4 = smov [#allocation6]  }
  0x67   : > { %p1042_p0 = scmp.ne.s32.totalorder %s1383_s11, %s1041_s17  ;;  %s1046_s28 = sshll.u32 %s1186_s4, 4  ;;  %s1047_s28 = int_to_ptr.vmem [resolvable:$false] %s1046_s28 }
  0x68   : > { %s1048_s25 = scalar_lea.vmem %s1047_s28, 128  ;;  %p1049_p4 = scmp.lt.s32.totalorder %s1383_s11, %s1047_s28 }
  0x69   : > { %p1044_p1 = pnand %p1042_p0, %p1028_p2  ;;  %p1050_p6 = scmp.lt.s32.totalorder %s1048_s25, %s1041_s17 }
  0x6b   : > { %p1045_p9 = pneg %p1044_p1  ;;  %p1051_p10 = por %p1050_p6, %p1049_p4 }
  0x6d   : > { %p1052_p3 = pnand %p1051_p10, %p1045_p9 }
  0x6f   : > { %1055 = shalt.err (!%p1052_p3)
}
  0x70   : > { %887 = dma.hbm_to_vmem [thread:$0]  (!%p1379_p11), %s1374_s20, 64, %s1383_s11, %s264_s19  }
  0x71   : > { %s282_s2 = sand.u32 1, %s1180_s26   ;;  %s286_s14 = scalar_lea.vmem [#allocation9], %s1365_s12 }
  0x72   : > { %s294_s8 = sshll.u32 %s286_s14, 4  ;;  %s283_s15 = scalar_lea.sflag [#allocation10], %s282_s2  ;;  %s295_s8 = int_to_ptr.vmem [resolvable:$true] %s294_s8 }
  0x73   : > { %s1056_s16 = scalar_lea.hbm %s1388_s18, 64  ;;  %s1061_s4 = scalar_lea.hbm %s1540_s1, 128 }
  0x74   : > { %p1057_p4 = scmp.ne.s32.totalorder %s1388_s18, %s1056_s16  ;;  %p1062_p5 = scmp.lt.u32.totalorder %s1388_s18, %s1540_s1 }
  0x75   : > { %p1063_p7 = scmp.lt.u32.totalorder %s1061_s4, %s1056_s16  ;;  %p1065_p0 = scmp.lt.u32.totalorder %s1056_s16, %s1388_s18 }
  0x76   : > { %p1059_p9 = pnand %p1057_p4, %p1028_p2 }
  0x77   : > { %p1064_p12 = por %p1063_p7, %p1062_p5 }
  0x78   : > { %p1060_p13 = pneg %p1059_p9 }
  0x79   : > { %p1066_p1 = por %p1065_p0, %p1064_p12 }
  0x7b   : > { %p1067_p6 = pnand %p1066_p1, %p1060_p13 }
  0x7d   : > { %1070 = shalt.err (!%p1067_p6)
}
  0x7e   : > { %s1071_s12 = scalar_lea.vmem %s295_s8, 64  ;;  %s1187_s20 = smov [#allocation9]  }
  0x7f   : > { %p1072_p10 = scmp.ne.s32.totalorder %s295_s8, %s1071_s12  ;;  %s1076_s11 = sshll.u32 %s1187_s20, 4  ;;  %s1077_s11 = int_to_ptr.vmem [resolvable:$false] %s1076_s11 }
  0x80   : > { %s1078_s19 = scalar_lea.vmem %s1077_s11, 128  ;;  %p1079_p9 = scmp.lt.s32.totalorder %s295_s8, %s1077_s11 }
  0x81   : > { %p1074_p3 = pnand %p1072_p10, %p1028_p2  ;;  %p1080_p8 = scmp.lt.s32.totalorder %s1078_s19, %s1071_s12 }
  0x83   : > { %p1075_p4 = pneg %p1074_p3  ;;  %p1081_p5 = por %p1080_p8, %p1079_p9 }
  0x85   : > { %p1082_p7 = pnand %p1081_p5, %p1075_p4 }
  0x87   : > { %1085 = shalt.err (!%p1082_p7)
}
  0x88   : > { %890 = dma.hbm_to_vmem [thread:$0]  (!%p1379_p11), %s1388_s18, 64, %s295_s8, %s283_s15  }
  0x89   : > { %p1566_p13 = scmp.ne.s32.totalorder %s1557_s7, 0 }
  0x8a   : > { %s1439_s2 = sand.u32 (!%p1566_p13), 1, %s1164_s22   ;;  %p1567_p2 = scmp.ne.s32.totalorder (!%p1566_p13), %s1555_s29, 0 }
  0x8b   : > { %303 = sbr.rel (%p1566_p13) target bundleno = 1198 (0x4ae), region = 44  ;;  %s806_s14 = sshll.u32 (!%p1566_p13), %s1439_s2, 2 }
  0x8c   : > { %s306_s16 = scalar_lea.sflag (!%p1566_p13), [#allocation7], %s1439_s2  ;;  %s309_s9 = scalar_lea.vmem (!%p1566_p13), [#allocation6], %s806_s14 }
  0x92   : > { %1139 = dma.done.wait (%p1567_p2), %s306_s16, 64  }
  0x93   : > { %1141 = vsyncadd (%p1567_p2), %s306_s16, 4294967232  ;;  %s314_s13 = sand.u32 1, %s1260_s27   ;;  %s318_s7 = scalar_lea.vmem [#allocation9], %s806_s14 }
  0x94   : > { %s315_s18 = scalar_lea.sflag [#allocation10], %s314_s13 }
  0x95   : > { %1143 = dma.done.wait (%p1567_p2), %s315_s18, 64  }
  0x96   : > { %1145 = vsyncadd (%p1567_p2), %s315_s18, 4294967232  ;;  %p1568_p8 = scmp.eq.s32.totalorder %s1260_s27, 0 }
  0x98   : > { %1147 = dma.done.wait (%p1568_p8), [#allocation10], 256   ;;  %p1569_p11 = pmov %p1568_p8 }
  0x99   : > { %p1570_p12 = pmov %p1568_p8 }
  0x9a   : > { %1149 = vsyncadd (%p1569_p11), [#allocation10], 4294967040 }
  0x9b   : > { %1151 = dma.done.wait (%p1570_p12), [#allocation13], 256   ;;  %p1571_p0 = pmov %p1568_p8 }
  0x9c   : > { %vm389_vm0 = vcmask 261120   ;;  %v1188_v0 = vmov 0.0   ;;  %vm1189_vm1 = vmmov 0   ;;  %v960_v1 = vld [vmem:[#allocation11] sm:$0xff]   ;;  %v961_v2 = vld [vmem:[#allocation12] sm:$0xff]   ;;  %v962_v3 = vld [vmem:[#allocation11 + $0x8] sm:$0xff]  }
  0x9d   : > { %1153 = vsyncadd (%p1571_p0), [#allocation13], 4294967040  ;;  %835 = vmatprep.subr.bf16.mxu0 %v1188_v0  ;;  %843 = vmatprep.subr.bf16.mxu1 %v1188_v0  ;;  %437 = vst.msk [vmem:[#allocation5] sm:$0xff] %vm389_vm0, %v1188_v0  ;;  %v963_v4 = vld [vmem:[#allocation12 + $0x8] sm:$0xff]   ;;  %v365_v5 = vld [vmem:[%s309_s9] sm:$0xf] }
  0x9e   : > { %839 = vmatprep.mubr.msk.bf16.mxu0 %vm1189_vm1, %v1188_v0  ;;  %847 = vmatprep.mubr.msk.bf16.mxu1 %vm1189_vm1, %v1188_v0  ;;  %v438_v6 = vld [vmem:[%s318_s7] sm:$0xf]  ;;  %v811_v7 = vld [vmem:[%s1542_s3] ss:$0 sm:$0xff]  ;;  %s1190_s17 = smov 96   ;;  %vm434_vm2 = vcmask 7168  }
  0x9f   : > { %836 = vmatpush3.bf16.msra.mxu0 %v960_v1  ;;  %844 = vmatpush3.bf16.msra.mxu1 %v961_v2  ;;  %v815_v8 = vld [vmem:[%s1544_s5] ss:$0 sm:$0xff]  ;;  %v1191_v23 = vmov -inf   ;;  %436 = vst.msk [vmem:[#allocation4] sm:$0xff] %vm434_vm2, %v1188_v0  ;;  %vm594_vm3 = vcmask 1043456   ;;  %vm556_vm4 = vcmask 64512  }
  0xa0   : > { %837 = vmatprep.subr.bf16.mxu0 %v1188_v0  ;;  %845 = vmatprep.subr.bf16.mxu1 %v1188_v0  ;;  %435 = vst.msk [vmem:[#allocation3] sm:$0xff] %vm434_vm2, %v1191_v23  ;;  %v1192_v31 = vmov 0   ;;  %s810_s4 = sshll.u32 %s1439_s2, 3  ;;  %s822_s28 = sshll.u32 %s1172_s24, 7 }
  0xa1   : > { %958 = vset.pattern.permute.xlu0 %v1192_v31  ;;  %959 = vset.pattern.permute.xlu1 %v1192_v31  ;;  %s359_s25 = scalar_lea.vmem [#allocation14], %s810_s4  ;;  %s1489_s19 = scalar_lea.hbm %s1545_s6, %s822_s28 }
  0xa2   : > { %s669_s12 = sshll.u32 %s359_s25, 4  ;;  %s655_s14 = scalar_lea.sflag [#allocation8], %s1439_s2  ;;  %s1491_s12 = int_to_ptr.vmem [resolvable:$true] %s669_s12 }
  0xa3   : > { %838 = vmatpush3.bf16.msra.mxu0 %v962_v3  ;;  %846 = vmatpush3.bf16.msra.mxu1 %v963_v4  ;;  %s1086_s16 = scalar_lea.vmem %s1491_s12, 128  ;;  %p1572_p6 = scmp.ne.s32.totalorder %s1563_s10, 0 }
  0xa4   : > { %851 = vmatprep.subr.bf16.mxu0 %v1188_v0  ;;  %857 = vmatprep.subr.bf16.mxu1 %v1188_v0  ;;  %v580_v50 = vld [vmem:[#allocation5] sm:$0xff]  ;;  %p1087_p1 = scmp.ne.s32.totalorder %s1491_s12, %s1086_s16  ;;  %s1193_s24 = smov [#allocation14]  }
  0xa5   : > { %s1090_s9 = sshll.u32 %s1193_s24, 4  ;;  %s1091_s9 = int_to_ptr.vmem [resolvable:$false] %s1090_s9 }
  0xa6   : > { %840 = vmatmul.mubr.msk.bf16.vlgmr.msra.gmra.mrb[0].mxu0 %vm389_vm0, %v365_v5  ;;  %848 = vmatmul.mubr.msk.bf16.vlgmr.msra.gmra.mrb[0].mxu1 %vm389_vm0, %v438_v6  ;;  %v572_v44 = vld [vmem:[#allocation4] sm:$0xff]  ;;  %p1088_p10 = pnand %p1087_p1, %p1572_p6  ;;  %s1092_s13 = scalar_lea.vmem %s1091_s9, 256 }
  0xa7   : > { %853 = vmatprep.mubr.msk.bf16.mxu0 %vm1189_vm1, %v1188_v0  ;;  %859 = vmatprep.mubr.msk.bf16.mxu1 %vm1189_vm1, %v1188_v0  ;;  %v555_v32 = vld [vmem:[#allocation3] sm:$0xff]  ;;  %p1093_p4 = scmp.lt.s32.totalorder %s1491_s12, %s1091_s9  ;;  %p1094_p9 = scmp.lt.s32.totalorder %s1092_s13, %s1086_s16 }
  0xa8   : > { %p1089_p3 = pneg %p1088_p10 }
  0xa9   : > { %p1095_p5 = por %p1094_p9, %p1093_p4 }
  0xab   : > { %p1096_p7 = pnand %p1095_p5, %p1089_p3 }
 0x179   : > { %v427_v9 = vpop.f32.mrb[0].mxu0  ;;  %v500_v11 = vpop.f32.mrb[0].mxu1 }
 0x17a   : > { %v428_v10 = vadd.f32 %v811_v7, %v427_v9  ;;  %v841_v12 = vpop.f32.mrb[1].mxu0  ;;  %v501_v13 = vadd.f32 %v815_v8, %v500_v11  ;;  %v849_v14 = vpop.f32.mrb[1].mxu1 }
 0x17b   : > { %v430_v15 = vpop.f32.mrb[2].mxu0  ;;  %v503_v16 = vpop.f32.mrb[2].mxu1 }
 0x17c   : > { %433 = vst.msk [vmem:[#allocation2] sm:$0xff] %vm389_vm0, %v428_v10  ;;  %v842_v17 = vpop.f32.mrb[3].mxu0  ;;  %v506_v18 = vpack.c.bf16 %v501_v13, %v501_v13  ;;  %v850_v19 = vpop.f32.mrb[3].mxu1 }
 0x17e   : > { %v513_v20 = vsel %vm389_vm0, %v506_v18, 0  ;;  %589 = vrot.lane.b32.xlu1 %v506_v18, %s1190_s17 }
 0x17f   : > { %852 = vmatpush3.bf16.xpose.msra.mxu0 %v513_v20 }
 0x183   : > { %v507_v21 = vld [vmem:[#allocation2] sm:$0xff] }
 0x184   : > { %v508_v22 = vpack.c.bf16 %v507_v21, %v507_v21 }
 0x186   : > { %854 = vmatmul.mubr.msk.bf16.vlgmr.msra.gmra.mrb[4].mxu0 %vm389_vm0, %v508_v22 }
 0x1f0   : > { %v590_v24 = vpop.permute.xlu1 %589 }
 0x1f1   : > { %v596_v25 = vsel %vm594_vm3, %v590_v24, 0 }
 0x1f2   : > { %858 = vmatpush3.bf16.msra.mxu1 %v596_v25 }
 0x259   : > { %v549_v26 = vpop.f32.mrb[4].mxu0 }
 0x25a   : > { %v855_v27 = vpop.f32.mrb[5].mxu0  ;;  %v557_v28 = vsel %vm556_vm4, %v549_v26, -inf }
 0x25b   : > { %558 = vmax.xlane.f32.xlu0 %v557_v28  ;;  %v552_v29 = vpop.f32.mrb[6].mxu0 }
 0x25c   : > { %v856_v30 = vpop.f32.mrb[7].mxu0 }
 0x2e8   : > { %v559_v33 = vpop.xlane.xlu0 %558 }
 0x2e9   : > { %v560_v34 = vmax.f32 %v555_v32, %v559_v33 }
 0x2eb   : > { %v561_v35 = vsub.f32 %v555_v32, %v560_v34  ;;  %640 = vst.msk [vmem:[#allocation3] sm:$0xff] %vm434_vm2, %v560_v34  ;;  %566 = vperm.xlu0 %958, %v560_v34  }
 0x2ed   : > { %v562_v42 = vmul.f32 1.442695, %v561_v35 }
 0x36a   : > { %v567_v36 = vpop.permute.xlu0 %566 }
 0x36b   : > { %v569_v37 = vsub.f32 %v549_v26, %v567_v36 }
 0x36d   : > { %v570_v38 = vmul.f32 1.442695, %v569_v37 }
 0x36f   : > { %964 = vpow2.f32 %v570_v38 }
 0x370   : > { %966 = vpow2.f32 %v562_v42 }
 0x379   : > { %v965_v39 = vpop.eup %964 }
 0x37a   : > { %v574_v40 = vsel %vm556_vm4, %v965_v39, 0.0  ;;  %v587_v41 = vpack.c.bf16 %v965_v39, %v965_v39  ;;  %v967_v43 = vpop.eup %966 }
 0x37b   : > { %575 = vadd.xlane.f32.xlu1 %v574_v40  ;;  %v573_v45 = vmul.f32 %v967_v43, %v572_v44 }
 0x37c   : > { %860 = vmatmul.mubr.msk.bf16.vlgmr.msra.gmra.mrb[4].mxu1 %vm556_vm4, %v587_v41 }
 0x38c   : > { %583 = vperm.xlu1 %959, %v967_v43  }
 0x408   : > { %v576_v46 = vpop.xlane.xlu1 %575 }
 0x409   : > { %v577_v47 = vadd.f32 %v576_v46, %v573_v45 }
 0x40b   : > { %579 = vst.msk [vmem:[#allocation4] sm:$0xff] %vm434_vm2, %v577_v47 }
 0x40c   : > { %v584_v51 = vpop.permute.xlu1 %583 }
 0x40d   : > { %v586_v52 = vmul.f32 %v584_v51, %v580_v50 }
 0x412   : > { %v645_v48 = vld [vmem:[#allocation4] sm:$0xff] }
 0x413   : > { %968 = vrcp.f32 %v645_v48 }
 0x41d   : > { %v969_v49 = vpop.eup %968 }
 0x41e   : > { %649 = vperm.xlu0 %958, %v969_v49  }
 0x44f   : > { %v632_v53 = vpop.f32.mrb[4].mxu1 }
 0x450   : > { %v638_v54 = vadd.f32 %v632_v53, %v586_v52  ;;  %v861_v55 = vpop.f32.mrb[5].mxu1 }
 0x451   : > { %v635_v56 = vpop.f32.mrb[6].mxu1 }
 0x452   : > { %639 = vst.msk [vmem:[#allocation5] sm:$0xff] %vm389_vm0, %v638_v54  ;;  %v862_v57 = vpop.f32.mrb[7].mxu1 }
 0x459   : > { %v644_v58 = vld [vmem:[#allocation5] sm:$0xff] }
 0x49d   : > { %v650_v59 = vpop.permute.xlu0 %649 }
 0x49e   : > { %v652_v60 = vmul.f32 %v650_v59, %v644_v58 }
 0x4a0   : > { %653 = vst.msk [vmem:[%s359_s25] sm:$0xff] %vm389_vm0, %v652_v60 }
 0x4a1   : > { %1099 = shalt.err (!%p1096_p7)
}
 0x4a2   : > { %s1100_s2 = scalar_lea.hbm %s1489_s19, 128  ;;  %s1104_s27 = scalar_lea.hbm %s1545_s6, 256 }
 0x4a3   : > { %p1101_p13 = scmp.ne.s32.totalorder %s1489_s19, %s1100_s2  ;;  %p1105_p11 = scmp.lt.u32.totalorder %s1489_s19, %s1545_s6 }
 0x4a4   : > { %p1106_p12 = scmp.lt.u32.totalorder %s1104_s27, %s1100_s2  ;;  %p1108_p1 = scmp.lt.u32.totalorder %s1100_s2, %s1489_s19 }
 0x4a5   : > { %p1102_p2 = pnand %p1101_p13, %p1572_p6 }
 0x4a6   : > { %p1107_p0 = por %p1106_p12, %p1105_p11 }
 0x4a7   : > { %p1103_p8 = pneg %p1102_p2 }
 0x4a8   : > { %p1109_p10 = por %p1108_p1, %p1107_p0 }
 0x4aa   : > { %p1110_p3 = pnand %p1109_p10, %p1103_p8 }
 0x4ac   : > { %1113 = shalt.err (!%p1110_p3)
}
 0x4ad   : > { %875 = dma.vmem_to_hbm [thread:$0]  (%p1572_p6), %s1491_s12, 128, %s1489_s19, %s655_s14  }
 0x4ae PF: > { %s681_s15 = sand.u32 1, %s1160_s21   ;;  %p1573_p4 = scmp.ne.s32.totalorder %s1556_s30, 0 }
 0x4af   : > { %p1574_p9 = scmp.ge.s32.totalorder %s1180_s26, 2  ;;  %s682_s17 = scalar_lea.sflag [#allocation8], %s681_s15 }
 0x4b1   : > { %p892_p5 = pnand %p1574_p9, %p1573_p4 }
 0x4b3   : > { %1155 = dma.done.wait (!%p892_p5), %s682_s17, 128  }
 0x4b4   : > { %1157 = vsyncadd (!%p892_p5), %s682_s17, 4294967168  ;;  %s26_s26 = sadd.s32 1, %s1180_s26   ;;  %s1575_s10 = sld [smem:[#allocation22_spill]] }
 0x4b5   : > { %p23_p7 = scmp.ge.s32.totalorder %s26_s26, 4   ;;  %s1576_s24 = sld [smem:[#allocation20_spill]] }
 0x4b6   : > { %s1577_s25 = sld [smem:[#allocation21_spill]]  ;;  %s1578_s21 = smov %s1164_s22 }
 0x4b7   : > { %s1579_s22 = smov %s1168_s23  ;;  %25 = sbr.rel (!%p23_p7) target bundleno = 12 (0xc), region = 118 }
 0x4ba   : > { %s1580_s23 = smov %s1575_s10 }
 0x4be   :  { %687 = vsyncpa [#allocation7], 1 }
 0x4bf   :  { %689 = vsyncpa [#allocation7 + $0x1], 1 }
 0x4c0   :  { %690 = vsyncpa [#allocation10], 1 }
 0x4c1   :  { %692 = vsyncpa [#allocation10 + $0x1], 1 }
 0x4c2   :  { %693 = vsyncpa [#allocation13], 1 }
 0x4c3   :  { %694 = vsyncpa [#allocation8], 1 }
 0x4c4   :  { %696 = vsyncpa [#allocation8 + $0x1], 1 }

</bundles_post_ra>
